<compile_context>
chip_gen: v6e
topology: v6e:2x2x1
jax: 0.10.0
libtpu: 0.0.40
codegen_flags: <defaults>
</compile_context>

<pallas_src>
import functools

import jax
import jax.numpy as jnp
from jax.experimental import pallas as pl
from jax.experimental.pallas import tpu as pltpu

jax.config.update("jax_default_matmul_precision", "highest")

LN_EPS = 1e-5
VMEM_LIMIT = 48 * 1024 * 1024  # below v7x physical 64 MiB, well below v5e/v6e


# ----------------------------- kernel helpers ------------------------------


def _layernorm2d(x, w, b):
    # x: (R, D); w, b: (1, D)
    mean = jnp.mean(x, axis=-1, keepdims=True)
    var = jnp.mean(jnp.square(x - mean), axis=-1, keepdims=True)
    return (x - mean) * jax.lax.rsqrt(var + LN_EPS) * w + b


def _quick_gelu(x):
    # CLIP's QuickGELU: x * sigmoid(1.702 x)
    return x * (1.0 / (1.0 + jnp.exp(-1.702 * x)))


# ------------------------------- kernels ------------------------------------


def add_pos_kernel(x_ref, pos_ref, o_ref):
    # x_ref: (1, L, D) tile for one class; pos_ref: (L, D) resident.
    o_ref[0] = x_ref[0] + pos_ref[...]


def clip_block_kernel(n_heads, x_ref, ln1w_ref, ln1b_ref, wqkv_ref, bqkv_ref,
                      wo_ref, bo_ref, ln2w_ref, ln2b_ref, w1_ref, b1_ref,
                      w2_ref, b2_ref, o_ref):
    x = x_ref[0].astype(jnp.float32)                      # (L, D)
    L, D = x.shape
    hd = D // n_heads
    scale = 1.0 / (hd ** 0.5)

    # ---- attention branch (pre-LN, causal) ----
    xn = _layernorm2d(x, ln1w_ref[...], ln1b_ref[...])
    qkv = jnp.dot(xn, wqkv_ref[...],
                  preferred_element_type=jnp.float32) + bqkv_ref[...]   # (L, 3D)

    row = jax.lax.broadcasted_iota(jnp.int32, (L, L), 0)
    col = jax.lax.broadcasted_iota(jnp.int32, (L, L), 1)
    neg = jnp.float32(-1e30)

    wo = wo_ref[...]                                      # (D, D)
    attn_out = jnp.zeros((L, D), jnp.float32)
    for h in range(n_heads):                              # small static loop
        q_h = qkv[:, h * hd:(h + 1) * hd]
        k_h = qkv[:, D + h * hd:D + (h + 1) * hd]
        v_h = qkv[:, 2 * D + h * hd:2 * D + (h + 1) * hd]
        s = jax.lax.dot_general(q_h, k_h, (((1,), (1,)), ((), ())),
                                preferred_element_type=jnp.float32) * scale
        s = jnp.where(col <= row, s, neg)                 # causal mask
        m = jnp.max(s, axis=-1, keepdims=True)
        p = jnp.exp(s - m)
        p = p / jnp.sum(p, axis=-1, keepdims=True)
        out_h = jnp.dot(p, v_h, preferred_element_type=jnp.float32)  # (L, hd)
        # concat(heads) @ Wo == sum_h head_h @ Wo[h*hd:(h+1)*hd, :]
        attn_out = attn_out + jnp.dot(out_h, wo[h * hd:(h + 1) * hd, :],
                                      preferred_element_type=jnp.float32)
    x = x + attn_out + bo_ref[...]

    # ---- MLP branch (pre-LN, QuickGELU) ----
    xn2 = _layernorm2d(x, ln2w_ref[...], ln2b_ref[...])
    h1 = jnp.dot(xn2, w1_ref[...],
                 preferred_element_type=jnp.float32) + b1_ref[...]
    h1 = _quick_gelu(h1)
    h2 = jnp.dot(h1, w2_ref[...],
                 preferred_element_type=jnp.float32) + b2_ref[...]
    x = x + h2

    o_ref[0] = x.astype(o_ref.dtype)


def final_proj_kernel(eot_ref, x_ref, lnw_ref, lnb_ref, proj_ref, o_ref):
    # eot_ref: (n_cls,) int32 in SMEM (scalar prefetch).
    i = pl.program_id(0)
    idx = eot_ref[i]
    x = x_ref[0].astype(jnp.float32)                      # (L, D)
    L, D = x.shape
    # Gather the EOT-token row via a mask + sublane reduction (no dynamic
    # sublane slicing, no degenerate matmul).
    sel = (jax.lax.broadcasted_iota(jnp.int32, (L, D), 0) == idx)
    rowv = jnp.sum(jnp.where(sel, x, 0.0), axis=0, keepdims=True)   # (1, D)
    rowv = _layernorm2d(rowv, lnw_ref[...], lnb_ref[...])
    y = jnp.dot(rowv, proj_ref[...], preferred_element_type=jnp.float32)
    o_ref[0] = y.astype(o_ref.dtype)


# ------------------------------- wrappers ------------------------------------


def _whole(arr):
    nd = arr.ndim
    return pl.BlockSpec(arr.shape, lambda i, _nd=nd: (0,) * _nd)


def add_positional(x, pos):
    n_cls, L, D = x.shape
    return pl.pallas_call(
        add_pos_kernel,
        out_shape=jax.ShapeDtypeStruct((n_cls, L, D), x.dtype),
        grid_spec=pltpu.PrefetchScalarGridSpec(
            num_scalar_prefetch=0,
            grid=(n_cls,),
            in_specs=[pl.BlockSpec((1, L, D), lambda i: (i, 0, 0)),
                      pl.BlockSpec((L, D), lambda i: (0, 0))],
            out_specs=pl.BlockSpec((1, L, D), lambda i: (i, 0, 0))),
        compiler_params=pltpu.CompilerParams(
            dimension_semantics=("parallel",),
            vmem_limit_bytes=VMEM_LIMIT),
    )(x, pos)


def clip_block(x, params, *, n_heads):
    n_cls, L, D = x.shape
    (ln1w, ln1b, wqkv, bqkv, wo, bo, ln2w, ln2b, w1, b1, w2, b2) = params
    hidden = w1.shape[1]

    flops = int(n_cls * (2 * L * D * 3 * D        # qkv projection
                         + 4 * L * L * D          # q@k^T and attn@v
                         + 2 * L * D * D          # output projection
                         + 4 * L * D * hidden))   # mlp (two matmuls)
    transcendentals = int(n_cls * (L * L + L * hidden))
    weight_bytes = 4 * (wqkv.size + wo.size + w1.size + w2.size
                        + bqkv.size + bo.size + b1.size + b2.size
                        + ln1w.size + ln1b.size + ln2w.size + ln2b.size)
    bytes_accessed = int(4 * 2 * n_cls * L * D + weight_bytes)

    in_specs = ([pl.BlockSpec((1, L, D), lambda i: (i, 0, 0))]
                + [_whole(w) for w in params])

    return pl.pallas_call(
        functools.partial(clip_block_kernel, n_heads),
        out_shape=jax.ShapeDtypeStruct((n_cls, L, D), x.dtype),
        grid_spec=pltpu.PrefetchScalarGridSpec(
            num_scalar_prefetch=0,
            grid=(n_cls,),
            in_specs=in_specs,
            out_specs=pl.BlockSpec((1, L, D), lambda i: (i, 0, 0))),
        compiler_params=pltpu.CompilerParams(
            dimension_semantics=("parallel",),
            vmem_limit_bytes=VMEM_LIMIT),
        cost_estimate=pl.CostEstimate(flops=flops,
                                      transcendentals=transcendentals,
                                      bytes_accessed=bytes_accessed),
    )(x, *params)


def final_projection(eot_idx, x, lnw, lnb, proj):
    n_cls, L, D = x.shape
    P = proj.shape[1]
    out = pl.pallas_call(
        final_proj_kernel,
        out_shape=jax.ShapeDtypeStruct((n_cls, 1, P), x.dtype),
        grid_spec=pltpu.PrefetchScalarGridSpec(
            num_scalar_prefetch=1,            # eot indices -> SMEM
            grid=(n_cls,),
            in_specs=[pl.BlockSpec((1, L, D), lambda i, eot: (i, 0, 0)),
                      pl.BlockSpec(lnw.shape, lambda i, eot: (0, 0)),
                      pl.BlockSpec(lnb.shape, lambda i, eot: (0, 0)),
                      pl.BlockSpec(proj.shape, lambda i, eot: (0, 0))],
            out_specs=pl.BlockSpec((1, 1, P), lambda i, eot: (i, 0, 0))),
        compiler_params=pltpu.CompilerParams(
            dimension_semantics=("parallel",),
            vmem_limit_bytes=VMEM_LIMIT),
    )(eot_idx, x, lnw, lnb, proj)
    return out[:, 0, :]


def text_encoder_forward(prompts, tokenized_prompts, compound_prompts, weights):
    """Pallas TextEncoder forward.  prompts: (n_cls, L, D) batch-first.

    The PyTorch permute(1,0,2) round-trip is layout-only; we stay batch-first.
    """
    x = add_positional(prompts, weights["pos_emb"])
    counter = 0
    for layer, params in enumerate(weights["layers"]):
        if layer > 0 and counter < len(compound_prompts):
            # MaPLe/DCG deep-prompt injection (done inside the modified
            # transformer in PyTorch): replace tokens [1 : 1+n_ctx).
            ctx = compound_prompts[counter]
            n_ctx = ctx.shape[0]
            B = x.shape[0]
            x = jnp.concatenate(
                [x[:, :1, :],
                 jnp.broadcast_to(ctx[None], (B, n_ctx, ctx.shape[1])).astype(x.dtype),
                 x[:, 1 + n_ctx:, :]],
                axis=1)
            counter += 1
        x = clip_block(x, params, n_heads=weights["n_heads"])
    eot = jnp.argmax(tokenized_prompts, axis=-1).astype(jnp.int32)
    return final_projection(eot, x, weights["ln_final_w"],
                            weights["ln_final_b"], weights["text_projection"])


# ------------------------------ pure-JAX reference ---------------------------


def text_encoder_reference(prompts, tokenized_prompts, compound_prompts, weights):
    def ln(z, w, b):
        m = jnp.mean(z, axis=-1, keepdims=True)
        v = jnp.mean(jnp.square(z - m), axis=-1, keepdims=True)
        return (z - m) * jax.lax.rsqrt(v + LN_EPS) * w + b

    n_heads = weights["n_heads"]
    x = prompts + weights["pos_emb"][None]
    counter = 0
    for layer, p in enumerate(weights["layers"]):
        (ln1w, ln1b, wqkv, bqkv, wo, bo, ln2w, ln2b, w1, b1, w2, b2) = p
        if layer > 0 and counter < len(compound_prompts):
            ctx = compound_prompts[counter]
            B = x.shape[0]
            x = jnp.concatenate(
                [x[:, :1, :],
                 jnp.broadcast_to(ctx[None], (B,) + ctx.shape),
                 x[:, 1 + ctx.shape[0]:, :]], axis=1)
            counter += 1
        B, L, D = x.shape
        hd = D // n_heads
        xn = ln(x, ln1w, ln1b)
        qkv = xn @ wqkv + bqkv
        q, k, v = jnp.split(qkv, 3, axis=-1)
        q = q.reshape(B, L, n_heads, hd).transpose(0, 2, 1, 3)
        k = k.reshape(B, L, n_heads, hd).transpose(0, 2, 1, 3)
        v = v.reshape(B, L, n_heads, hd).transpose(0, 2, 1, 3)
        s = jnp.einsum("bhqd,bhkd->bhqk", q, k) / (hd ** 0.5)
        causal = jnp.tril(jnp.ones((L, L), bool))
        s = jnp.where(causal, s, -1e30)
        m = jnp.max(s, axis=-1, keepdims=True)
        pr = jnp.exp(s - m)
        pr = pr / jnp.sum(pr, axis=-1, keepdims=True)
        o = jnp.einsum("bhqk,bhkd->bhqd", pr, v).transpose(0, 2, 1, 3).reshape(B, L, D)
        x = x + (o @ wo + bo)
        xn2 = ln(x, ln2w, ln2b)
        h1 = xn2 @ w1 + b1
        h1 = _quick_gelu(h1)
        x = x + (h1 @ w2 + b2)
    xn = ln(x, weights["ln_final_w"], weights["ln_final_b"])
    eot = jnp.argmax(tokenized_prompts, axis=-1)
    sel = xn[jnp.arange(x.shape[0]), eot]
    return sel @ weights["text_projection"]


# --------------------------------- main --------------------------------------


def init_weights(key, *, n_layers, L, D, n_heads, P):
    keys = iter(jax.random.split(key, 64))
    s = 0.02
    pos_emb = s * jax.random.normal(next(keys), (L, D), jnp.float32)
    layers = []
    hidden = 4 * D
    for _ in range(n_layers):
        ln1w = 1.0 + s * jax.random.normal(next(keys), (1, D), jnp.float32)
        ln1b = s * jax.random.normal(next(keys), (1, D), jnp.float32)
        wqkv = s * jax.random.normal(next(keys), (D, 3 * D), jnp.float32)
        bqkv = s * jax.random.normal(next(keys), (1, 3 * D), jnp.float32)
        wo = s * jax.random.normal(next(keys), (D, D), jnp.float32)
        bo = s * jax.random.normal(next(keys), (1, D), jnp.float32)
        ln2w = 1.0 + s * jax.random.normal(next(keys), (1, D), jnp.float32)
        ln2b = s * jax.random.normal(next(keys), (1, D), jnp.float32)
        w1 = s * jax.random.normal(next(keys), (D, hidden), jnp.float32)
        b1 = s * jax.random.normal(next(keys), (1, hidden), jnp.float32)
        w2 = s * jax.random.normal(next(keys), (hidden, D), jnp.float32)
        b2 = s * jax.random.normal(next(keys), (1, D), jnp.float32)
        layers.append((ln1w, ln1b, wqkv, bqkv, wo, bo, ln2w, ln2b, w1, b1, w2, b2))
    ln_final_w = 1.0 + s * jax.random.normal(next(keys), (1, D), jnp.float32)
    ln_final_b = s * jax.random.normal(next(keys), (1, D), jnp.float32)
    text_projection = s * jax.random.normal(next(keys), (D, P), jnp.float32)
    return dict(pos_emb=pos_emb, layers=layers, ln_final_w=ln_final_w,
                ln_final_b=ln_final_b, text_projection=text_projection,
                n_heads=n_heads)


if __name__ == "__main__":
    key = jax.random.PRNGKey(0)
    k_w, k_p, k_t, k_c = jax.random.split(key, 4)

    # Small shapes consistent with the module: n_cls prompts of seq_len tokens,
    # transformer width D with H heads, depth 2, one deep compound prompt.
    n_cls, seq_len, d_model, n_heads, n_layers, n_ctx, proj_dim = 4, 8, 32, 4, 2, 2, 32

    weights = init_weights(k_w, n_layers=n_layers, L=seq_len, D=d_model,
                           n_heads=n_heads, P=proj_dim)

    prompts = jax.random.normal(k_p, (n_cls, seq_len, d_model), jnp.float32)
    compound_prompts_deeper_text = [
        0.02 * jax.random.normal(k_c, (n_ctx, d_model), jnp.float32)
        for _ in range(n_layers - 1)
    ]
    # tokenized prompts: random ids with the EOT token (largest id) at a known
    # position per class -> argmax(dim=-1) selects that token.
    eot_pos = jnp.array([3, 5, 7, 4], jnp.int32)
    ids = jax.random.randint(k_t, (n_cls, seq_len), 1, 100, jnp.int32)
    tokenized_prompts = ids.at[jnp.arange(n_cls), eot_pos].set(49407)

    out = text_encoder_forward(prompts, tokenized_prompts,
                               compound_prompts_deeper_text, weights)
    out = jax.block_until_ready(out)

    ref = text_encoder_reference(prompts, tokenized_prompts,
                                 compound_prompts_deeper_text, weights)
    assert out.shape == (n_cls, proj_dim)
    assert jnp.allclose(out, ref, atol=1e-4, rtol=1e-4), "mismatch vs reference"

    print("KERNEL_OK")
</pallas_src>

<mosaic_0001>
module attributes {stable_mosaic.version = 11 : i64} {
  func.func @add_pos_kernel(%arg0: i32, %arg1: memref<1x8x32xf32, #tpu.memory_space<vmem>>, %arg2: memref<8x32xf32, #tpu.memory_space<vmem>>, %arg3: memref<1x8x32xf32, #tpu.memory_space<vmem>>) attributes {dimension_semantics = [#tpu.dimension_semantics<parallel>], iteration_bounds = array<i64: 4>, scalar_prefetch = 0 : i64, scratch_operands = 0 : i64, tpu.core_type = #tpu.core_type<tc>, window_params = [{transform_indices = @transform_0, window_bounds = array<i64: 1, 8, 32>}, {pipeline_mode = #tpu.pipeline_mode<synchronous>, transform_indices = @transform_1, window_bounds = array<i64: 8, 32>}, {transform_indices = @transform_2, window_bounds = array<i64: 1, 8, 32>}]} {
    %c0 = arith.constant 0 : index
    %c0_0 = arith.constant 0 : index
    %c0_1 = arith.constant 0 : index
    %0 = vector.load %arg1[%c0, %c0_0, %c0_1] : memref<1x8x32xf32, #tpu.memory_space<vmem>>, vector<1x8x32xf32>
    %1 = vector.shape_cast %0 : vector<1x8x32xf32> to vector<8x32xf32>
    %c0_2 = arith.constant 0 : index
    %c0_3 = arith.constant 0 : index
    %2 = vector.load %arg2[%c0_2, %c0_3] : memref<8x32xf32, #tpu.memory_space<vmem>>, vector<8x32xf32>
    %3 = arith.addf %1, %2 : vector<8x32xf32>
    %c0_4 = arith.constant 0 : index
    %c0_5 = arith.constant 0 : index
    %c0_6 = arith.constant 0 : index
    %4 = vector.load %arg3[%c0_4, %c0_5, %c0_6] : memref<1x8x32xf32, #tpu.memory_space<vmem>>, vector<1x8x32xf32>
    %5 = vector.shape_cast %4 : vector<1x8x32xf32> to vector<8x32xf32>
    %6 = vector.shape_cast %3 : vector<8x32xf32> to vector<1x8x32xf32>
    tpu.vector_store %arg3[%c0_4, %c0_5, %c0_6], %6 {strides = array<i32>} : memref<1x8x32xf32, #tpu.memory_space<vmem>>, vector<1x8x32xf32>,
    return
  }
  func.func @transform_0(%arg0: i32) -> (i32, i32, i32) {
    %c0_i32 = arith.constant 0 : i32
    %c0_i32_0 = arith.constant 0 : i32
    %c0_i32_1 = arith.constant 0 : i32
    return %arg0, %c0_i32, %c0_i32_0 : i32, i32, i32
  }
  func.func @transform_1(%arg0: i32) -> (i32, i32) {
    %c0_i32 = arith.constant 0 : i32
    %c0_i32_0 = arith.constant 0 : i32
    %c0_i32_1 = arith.constant 0 : i32
    return %c0_i32, %c0_i32_0 : i32, i32
  }
  func.func @transform_2(%arg0: i32) -> (i32, i32, i32) {
    %c0_i32 = arith.constant 0 : i32
    %c0_i32_0 = arith.constant 0 : i32
    %c0_i32_1 = arith.constant 0 : i32
    return %arg0, %c0_i32, %c0_i32_0 : i32, i32, i32
  }
}

</mosaic_0001>

<bundles_post_ra>
// kernel: tpu_custom_call.1
= control target key start
LH: loop header
LB: loop body
LE: loop exit
PB: predicated region body
PF: predicated region fallthrough
CT: control target
= control target key end

     0   :  { %7 = vsyncpa [#allocation3], 0  ;;  %s648_s0 = inlined_call_operand.hbm [shape: f32[4,8,32], index: 0, kind: input, shape index: {}]   ;;  %s649_s1 = inlined_call_operand.hbm [shape: f32[8,32], index: 1, kind: input, shape index: {}]   ;;  %s650_s2 = inlined_call_operand.hbm [shape: f32[4,8,32], index: 2, kind: output, shape index: {}]  }
   0x1   :  { %9 = vsyncpa [#allocation3 + $0x1], 0 }
   0x2   :  { %10 = vsyncpa [#allocation6], 0 }
   0x3   :  { %11 = vsyncpa [#allocation4], 0 }
   0x4   :  { %13 = vsyncpa [#allocation4 + $0x1], 0  ;;  %s484_s9 = smov 0   ;;  %s486_s10 = smov 0  }
   0x5   :  { %s488_s11 = smov 0   ;;  %s490_s12 = smov 0  }
   0x6 LB: > { %s505_s13 = sadd.s32 4294967295, %s464_s12   ;;  %s271_s14 = sadd.s32 4294967294, %s464_s12   ;;  %s464_s12 = sphi %s490_s12, %s672_s12   ;;  %s460_s11 = sphi %s488_s11, %s671_s11   ;;  %s456_s10 = sphi %s486_s10, %s670_s10   ;;  %s452_s9 = sphi %s484_s9, %s669_s9  }
   0x7   : > { %p39_p0 = scmp.ne.s32.totalorder %s456_s10, %s452_s9  ;;  %p651_p1 = scmp.eq.s32.totalorder %s505_s13, 0 }
   0x8   : > { %p90_p3 = scmp.eq.s32.totalorder %s271_s14, 3  ;;  %p272_p5 = scmp.ge.s32.totalorder %s464_s12, 1 }
   0x9   : > { %p514_p4 = por %p651_p1, %p39_p0  ;;  %p97_p7 = scmp.lt.s32.totalorder %s464_s12, 5 }
   0xa   : > { %p519_p6 = por %p90_p3, %p39_p0  ;;  %s466_s18 = smov [#allocation5]  }
   0xb   : > { %s655_s15 = scalar_select %p514_p4, 1, 0 }
   0xc   : > { %s656_s16 = scalar_select %p519_p6, 1, 0 }
   0xd   : > { %p524_p8 = pnand %p272_p5, %p97_p7  ;;  %s110_s19 = sshll.u32 %s466_s18, 4  ;;  %s111_s19 = int_to_ptr.vmem [resolvable:$true] %s110_s19 }
   0xe   : > { %s531_s20 = sadd.s32 1, %s464_s12   ;;  %s26_s24 = sadd.s32 1, %s460_s11 }
   0xf   : > { %s657_s17 = scalar_select %p524_p8, 1, 0 }
  0x10   : > { %p293_p9 = pneg %p524_p8  ;;  %s23_s22 = ssub.s32 %s464_s12, %s531_s20 }
  0x11   : > { %p541_p11 = scmp.eq.s32.totalorder %s23_s22, 0  ;;  %p33_p12 = scmp.ne.s32.totalorder %s460_s11, %s456_s10 }
  0x12   : > { %p535_p10 = pnand %p293_p9, %p651_p1  ;;  %s353_s25 = scalar_lea.vmem %s111_s19, 128 }
  0x13   : > { %p354_p0 = scmp.ne.s32.totalorder %s111_s19, %s353_s25  ;;  %p361_p7 = scmp.lt.s32.totalorder %s111_s19, %s111_s19 }
  0x14   : > { %p344_p13 = pneg %p535_p10  ;;  %p362_p2 = scmp.lt.s32.totalorder %s353_s25, %s353_s25 }
  0x16   : > { %p356_p3 = pnand %p354_p0, %p344_p13  ;;  %p363_p9 = por %p362_p2, %p361_p7 }
  0x18   : > { %p357_p5 = pneg %p356_p3 }
  0x1a   : > { %p364_p1 = pnand %p363_p9, %p357_p5 }
  0x1c   : > { %367 = shalt.err (!%p364_p1)
}
  0x1d   : > { %296 = dma.hbm_to_vmem [thread:$0]  (!%p535_p10), %s649_s1, 128, %s111_s19, [#allocation6]  }
  0x1e   : > { %s558_s28 = scalar_select %p541_p11, %s460_s11, %s26_s24  }
  0x1f   : > { %p34_p1 = scmp.eq.s32.totalorder %s464_s12, 0  ;;  %p660_p2 = scmp.eq.s32.totalorder %s505_s13, 3 }
  0x20   : > { %p306_p0 = scmp.lt.s32.totalorder %s464_s12, 4  ;;  %s121_s30 = sand.u32 1, %s460_s11  }
  0x21   : > { %p566_p13 = por %p660_p2, %p33_p12  ;;  %p35_p3 = por %p34_p1, %p33_p12 }
  0x22   : > { %s275_s3 = sshll.u32 %s121_s30, 3  ;;  %s276_s4 = sshll.u32 %s464_s12, 7 }
  0x23   : > { %s661_s29 = scalar_select %p566_p13, 1, 0 }
  0x24   : > { %s579_s7 = scalar_lea.hbm %s648_s0, %s276_s4  ;;  %s125_s8 = scalar_lea.vmem [#allocation2], %s275_s3 }
  0x25   : > { %s132_s14 = sshll.u32 %s125_s8, 4  ;;  %p581_p10 = pnand %p306_p0, %p35_p3  ;;  %s133_s14 = int_to_ptr.vmem [resolvable:$true] %s132_s14 }
  0x26   : > { %s122_s19 = scalar_lea.sflag [#allocation3], %s121_s30  ;;  %s368_s21 = scalar_lea.hbm %s579_s7, 128 }
  0x27   : > { %p369_p11 = scmp.ne.s32.totalorder %s579_s7, %s368_s21  ;;  %p370_p12 = pneg %p581_p10 }
  0x28   : > { %s373_s24 = scalar_lea.hbm %s648_s0, 512  ;;  %p374_p9 = scmp.lt.s32.totalorder %s579_s7, %s648_s0 }
  0x29   : > { %p371_p5 = pnand %p370_p12, %p369_p11  ;;  %p375_p1 = scmp.lt.s32.totalorder %s373_s24, %s368_s21 }
  0x2b   : > { %p372_p7 = pneg %p371_p5  ;;  %p376_p2 = por %p375_p1, %p374_p9 }
  0x2d   : > { %p377_p0 = pnand %p376_p2, %p372_p7 }
  0x2f   : > { %380 = shalt.err (!%p377_p0)
}
  0x30   : > { %s381_s27 = scalar_lea.vmem %s133_s14, 128  ;;  %s467_s30 = smov [#allocation2]  }
  0x31   : > { %p382_p3 = scmp.ne.s32.totalorder %s133_s14, %s381_s27  ;;  %s386_s3 = sshll.u32 %s467_s30, 4  ;;  %s387_s3 = int_to_ptr.vmem [resolvable:$false] %s386_s3 }
  0x32   : > { %s388_s4 = scalar_lea.vmem %s387_s3, 256  ;;  %p389_p11 = scmp.lt.s32.totalorder %s133_s14, %s387_s3 }
  0x33   : > { %p384_p6 = pnand %p382_p3, %p370_p12  ;;  %p390_p5 = scmp.lt.s32.totalorder %s388_s4, %s381_s27 }
  0x35   : > { %p385_p13 = pneg %p384_p6  ;;  %p391_p4 = por %p390_p5, %p389_p11 }
  0x37   : > { %p392_p8 = pnand %p391_p4, %p385_p13 }
  0x39   : > { %395 = shalt.err (!%p392_p8)
}
  0x3a   : > { %300 = dma.hbm_to_vmem [thread:$0]  (!%p581_p10), %s579_s7, 128, %s133_s14, %s122_s19  }
  0x3b   : > { %p663_p7 = scmp.ne.s32.totalorder %s657_s17, 0 }
  0x3c   : > { %s602_s5 = sand.u32 (!%p663_p7), 1, %s456_s10   ;;  %p664_p6 = scmp.ne.s32.totalorder (!%p663_p7), %s655_s15, 0 }
  0x3d   : > { %141 = sbr.rel (%p663_p7) target bundleno = 95 (0x5f), region = 28  ;;  %s278_s6 = sshll.u32 (!%p663_p7), %s602_s5, 3 }
  0x3e   : > { %s144_s8 = scalar_lea.sflag (!%p663_p7), [#allocation3], %s602_s5  ;;  %s147_s21 = scalar_lea.vmem (!%p663_p7), [#allocation2], %s278_s6 }
  0x42   : > { %439 = dma.done.wait (%p664_p6), %s144_s8, 128  }
  0x43   : > { %441 = vsyncadd (%p664_p6), %s144_s8, 4294967168  ;;  %p665_p4 = scmp.eq.s32.totalorder %s505_s13, 0 }
  0x45   : > { %443 = dma.done.wait (%p665_p4), [#allocation6], 128   ;;  %p666_p8 = pmov %p665_p4 }
  0x46   : > { %s171_s17 = scalar_lea.vmem [#allocation7], %s278_s6  ;;  %s282_s14 = sshll.u32 %s505_s13, 7  ;;  %v172_v0 = vld [vmem:[%s147_s21] sm:$0xff]  ;;  %v173_v1 = vld [vmem:[#allocation5] sm:$0xff]  ;;  %vm175_vm0 = vcmask 261120  }
  0x47   : > { %445 = vsyncadd (%p666_p8), [#allocation6], 4294967168  ;;  %s191_s7 = sshll.u32 %s171_s17, 4  ;;  %v174_v2 = vadd.f32 %v173_v1, %v172_v0  ;;  %s189_s19 = scalar_lea.hbm %s650_s2, %s282_s14  ;;  %s192_s7 = int_to_ptr.vmem [resolvable:$true] %s191_s7 }
  0x48   : > { %s178_s22 = scalar_lea.sflag [#allocation4], %s602_s5  ;;  %s396_s23 = scalar_lea.vmem %s192_s7, 128 }
  0x49   : > { %176 = vst.msk [vmem:[%s171_s17] sm:$0xff] %vm175_vm0, %v174_v2  ;;  %p397_p13 = scmp.ne.s32.totalorder %s192_s7, %s396_s23  ;;  %p667_p10 = scmp.ne.s32.totalorder %s661_s29, 0 }
  0x4a   : > { %s468_s24 = smov [#allocation7]  }
  0x4b   : > { %p398_p12 = pnand %p397_p13, %p667_p10  ;;  %s400_s25 = sshll.u32 %s468_s24, 4  ;;  %s401_s25 = int_to_ptr.vmem [resolvable:$false] %s400_s25 }
  0x4c   : > { %s402_s13 = scalar_lea.vmem %s401_s25, 256  ;;  %p403_p1 = scmp.lt.s32.totalorder %s192_s7, %s401_s25 }
  0x4d   : > { %p399_p9 = pneg %p398_p12  ;;  %p404_p2 = scmp.lt.s32.totalorder %s402_s13, %s396_s23 }
  0x4f   : > { %p405_p0 = por %p404_p2, %p403_p1 }
  0x51   : > { %p406_p3 = pnand %p405_p0, %p399_p9 }
  0x53   : > { %409 = shalt.err (!%p406_p3)
}
  0x54   : > { %s410_s26 = scalar_lea.hbm %s189_s19, 128  ;;  %s414_s3 = scalar_lea.hbm %s650_s2, 512 }
  0x55   : > { %p411_p11 = scmp.ne.s32.totalorder %s189_s19, %s410_s26  ;;  %p415_p6 = scmp.lt.s32.totalorder %s189_s19, %s650_s2 }
  0x56   : > { %p416_p4 = scmp.lt.s32.totalorder %s414_s3, %s410_s26 }
  0x57   : > { %p412_p5 = pnand %p411_p11, %p667_p10 }
  0x58   : > { %p417_p8 = por %p416_p4, %p415_p6 }
  0x59   : > { %p413_p7 = pneg %p412_p5 }
  0x5b   : > { %p418_p13 = pnand %p417_p8, %p413_p7 }
  0x5d   : > { %421 = shalt.err (!%p418_p13)
}
  0x5e   : > { %291 = dma.vmem_to_hbm [thread:$0]  (%p667_p10), %s192_s7, 128, %s189_s19, %s178_s22  }
  0x5f PF: > { %p308_p12 = scmp.ge.s32.totalorder %s464_s12, 2  ;;  %s203_s6 = sand.u32 1, %s452_s9  }
  0x60   : > { %p668_p9 = scmp.ne.s32.totalorder %s656_s16, 0  ;;  %s204_s8 = scalar_lea.sflag [#allocation4], %s203_s6 }
  0x62   : > { %p302_p1 = pnand %p308_p12, %p668_p9 }
  0x64   : > { %p303_p2 = pneg %p302_p1 }
  0x66   : > { %447 = dma.done.wait (%p303_p2), %s204_s8, 128  }
  0x67   : > { %449 = vsyncadd (%p303_p2), %s204_s8, 4294967168  ;;  %p16_p0 = scmp.ge.s32.totalorder %s531_s20, 6   ;;  %s669_s9 = smov %s456_s10 }
  0x68   : > { %s670_s10 = smov %s460_s11  ;;  %s671_s11 = smov %s558_s28 }
  0x69   : > { %s672_s12 = smov %s531_s20  ;;  %18 = sbr.rel (!%p16_p0) target bundleno = 6 (0x6), region = 77 }
  0x6e   :  { %209 = vsyncpa [#allocation3], 1 }
  0x6f   :  { %211 = vsyncpa [#allocation3 + $0x1], 1 }
  0x70   :  { %212 = vsyncpa [#allocation6], 1 }
  0x71   :  { %213 = vsyncpa [#allocation4], 1 }
  0x72   :  { %215 = vsyncpa [#allocation4 + $0x1], 1 }

</bundles_post_ra>
